<compile_context>
chip_gen: v6e
topology: v6e:2x2x1
jax: 0.10.0
libtpu: 0.0.40
codegen_flags: <defaults>
</compile_context>

<pallas_src>
import functools

import jax
import jax.numpy as jnp
from jax.experimental import pallas as pl
from jax.experimental.pallas import tpu as pltpu


# ----------------------------------------------------------------------------
# Kernel
# ----------------------------------------------------------------------------
def _layer_norm_kernel(alpha_ref, bias_ref, x_ref, o_ref, *, eps, d):
    # x_ref/o_ref: (TM, D) VMEM tiles.  alpha_ref/bias_ref: (1, 1) scalars in SMEM.
    x = x_ref[...].astype(jnp.float32)

    # Two-pass statistics in f32 (exact parity with torch; avoids E[x^2]-mean^2
    # cancellation).  torch.std defaults to the unbiased estimator (D - 1);
    # for D == 1 torch yields NaN std, which the NaN constant below reproduces
    # without a trace-time ZeroDivisionError.
    mean = jnp.sum(x, axis=-1, keepdims=True) * (1.0 / d)
    centered = x - mean
    inv_dm1 = (1.0 / (d - 1)) if d > 1 else float("nan")
    var = jnp.sum(centered * centered, axis=-1, keepdims=True) * inv_dm1
    std = jnp.sqrt(var)

    # Exact reciprocal (parity with torch's divide), one per row.
    inv = pl.reciprocal(std + eps, approx=False)

    alpha = alpha_ref[0, 0]
    bias = bias_ref[0, 0]

    # Fold everything into a per-row affine: out = x * scale + shift.
    scale = alpha * inv                    # (TM, 1)
    shift = bias - mean * scale            # (TM, 1)

    if o_ref.dtype == jnp.bfloat16:
        # v6e/v7x: output pass in bf16 against the native tile (halves vreg
        # bytes and VALU work on the write path).  On v5e Mosaic lowers this
        # with internal casts; functionally identical.
        o_ref[...] = x_ref[...] * scale.astype(jnp.bfloat16) + shift.astype(jnp.bfloat16)
    else:
        o_ref[...] = (x * scale + shift).astype(o_ref.dtype)


# ----------------------------------------------------------------------------
# Tiling / VMEM budgeting
# ----------------------------------------------------------------------------
def _vmem_capacity_bytes():
    """Per-core VMEM capacity; safe fallback (64 MiB = smallest generation)."""
    try:
        return int(pltpu.get_tpu_info().vmem_capacity_bytes)
    except Exception:
        return 64 * 1024 * 1024


def _per_row_bytes(d, itemsize):
    # Double-buffered native-dtype input + output pipeline tiles: 2*2*d*itemsize,
    # plus f32 temporaries (upcast x tile, centered, per-row vectors) ~ 5*d*4.
    return 4 * d * itemsize + 5 * d * 4


def _choose_row_tile(n_rows, d, itemsize, vmem_budget_bytes):
    """Largest row tile (multiple of 8) fitting the budget, with >=2 grid steps
    for moderate-to-large N so both v7x TensorCores get work."""
    per_row = _per_row_bytes(d, itemsize)
    tm = max(8, vmem_budget_bytes // per_row)

    # Guarantee enough grid steps for megacore sharding / pipeline overlap.
    if n_rows >= 256:
        min_steps = 4
    elif n_rows >= 16:
        min_steps = 2
    else:
        min_steps = 1
    tm = min(tm, pl.cdiv(n_rows, min_steps), n_rows)

    if tm < n_rows:
        tm = max(8, (tm // 8) * 8)          # keep the (8, 128) tiling rule happy
    return min(tm, n_rows)


# ----------------------------------------------------------------------------
# Wrapper
# ----------------------------------------------------------------------------
def layer_normalization(x, alpha, bias, epsilon=1e-6):
    """Pallas-TPU equivalent of LayerNormalization.forward for arbitrary-rank x."""
    orig_shape = x.shape
    d = orig_shape[-1]
    n = 1
    for s in orig_shape[:-1]:
        n *= s
    x2d = x.reshape(n, d)
    itemsize = jnp.dtype(x.dtype).itemsize

    cap = _vmem_capacity_bytes()
    budget = int(cap * 0.70)                 # ~45 MiB on v7x, ~90 MiB on v5e/v6e
    per_row = _per_row_bytes(d, itemsize)
    if 8 * per_row > int(0.9 * cap):
        # TODO(synk): add a D-tiled variant (second 'arbitrary' grid axis over D
        # with accumulator scratch + pl.when init/finalize) for very large D.
        raise NotImplementedError(
            f"last dim {d} too large for a single (8, D) VMEM tile on this chip")

    tm = _choose_row_tile(n, d, itemsize, budget)
    grid = (pl.cdiv(n, tm),)

    # Explicit scoped-VMEM limit (defaults are only 16 MiB v5e / 32 MiB v6e-v7x).
    needed = tm * per_row
    vmem_limit = int(min(0.92 * cap, max(budget, 1.25 * needed)))

    alpha_s = jnp.asarray(alpha, jnp.float32).reshape(1, 1)
    bias_s = jnp.asarray(bias, jnp.float32).reshape(1, 1)

    kernel = functools.partial(_layer_norm_kernel, eps=float(epsilon), d=d)

    cost = pl.CostEstimate(
        flops=6 * n * d,
        transcendentals=2 * n,               # sqrt + reciprocal per row
        bytes_accessed=2 * n * d * itemsize,
    )

    # TODO(synk): for D < 128 (demo D=32) the lane dim is under-utilized (masked
    # partial stores); a packed multi-rows-per-vreg path would help but is not
    # implemented here.
    out2d = pl.pallas_call(
        kernel,
        out_shape=jax.ShapeDtypeStruct((n, d), x.dtype),
        grid=grid,
        in_specs=[
            pl.BlockSpec(memory_space=pltpu.MemorySpace.SMEM),   # alpha (scalar)
            pl.BlockSpec(memory_space=pltpu.MemorySpace.SMEM),   # bias  (scalar)
            pl.BlockSpec((tm, d), lambda i: (i, 0)),             # x row tile
        ],
        out_specs=pl.BlockSpec((tm, d), lambda i: (i, 0)),
        compiler_params=pltpu.CompilerParams(
            dimension_semantics=("parallel",),
            vmem_limit_bytes=vmem_limit,
        ),
        cost_estimate=cost,
    )(alpha_s, bias_s, x2d)
    return out2d.reshape(orig_shape)


# ----------------------------------------------------------------------------
# Main
# ----------------------------------------------------------------------------
if __name__ == "__main__":
    B, S, D = 2, 8, 32
    eps = 1e-6

    key = jax.random.PRNGKey(0)
    x = jax.random.normal(key, (B, S, D), jnp.float32)

    # Module defaults are alpha=1, bias=0; use non-trivial values to exercise them.
    alpha = jnp.asarray([1.5], jnp.float32)
    bias = jnp.asarray([0.25], jnp.float32)

    out = layer_normalization(x, alpha, bias, eps)
    jax.block_until_ready(out)

    # Pure-JAX reference with torch semantics (unbiased std, eps added to std).
    mean = x.mean(axis=-1, keepdims=True)
    std = x.std(axis=-1, keepdims=True, ddof=1)
    expected = alpha[0] * (x - mean) / (std + eps) + bias[0]

    assert out.shape == x.shape
    assert jnp.allclose(out, expected, atol=1e-5, rtol=1e-5), (
        float(jnp.max(jnp.abs(out - expected)))
    )
    print("KERNEL_OK")
</pallas_src>

<mosaic_0001>
module attributes {stable_mosaic.version = 11 : i64} {
  func.func @_layer_norm_kernel(%arg0: i32, %arg1: memref<1x1xf32, #tpu.memory_space<smem>>, %arg2: memref<1x1xf32, #tpu.memory_space<smem>>, %arg3: memref<8x32xf32, #tpu.memory_space<vmem>>, %arg4: memref<8x32xf32, #tpu.memory_space<vmem>>) attributes {dimension_semantics = [#tpu.dimension_semantics<parallel>], iteration_bounds = array<i64: 2>, scalar_prefetch = 0 : i64, scratch_operands = 0 : i64, tpu.core_type = #tpu.core_type<tc>, window_params = [{transform_indices = @transform_0, window_bounds = array<i64: 1, 1>}, {transform_indices = @transform_1, window_bounds = array<i64: 1, 1>}, {transform_indices = @transform_2, window_bounds = array<i64: 8, 32>}, {transform_indices = @transform_3, window_bounds = array<i64: 8, 32>}]} {
    %c0 = arith.constant 0 : index
    %c0_0 = arith.constant 0 : index
    %0 = vector.load %arg3[%c0, %c0_0] : memref<8x32xf32, #tpu.memory_space<vmem>>, vector<8x32xf32>
    %cst = arith.constant dense<0.000000e+00> : vector<8xf32>
    %1 = vector.multi_reduction <add>, %0, %cst [1] : vector<8x32xf32> to vector<8xf32>
    %2 = vector.shape_cast %1 : vector<8xf32> to vector<8x1xf32>
    %cst_1 = arith.constant 3.125000e-02 : f32
    %3 = vector.broadcast %cst_1 : f32 to vector<8x1xf32>
    %4 = arith.mulf %2, %3 : vector<8x1xf32>
    %5 = vector.broadcast %4 : vector<8x1xf32> to vector<8x32xf32>
    %6 = arith.subf %0, %5 : vector<8x32xf32>
    %7 = arith.mulf %6, %6 : vector<8x32xf32>
    %cst_2 = arith.constant dense<0.000000e+00> : vector<8xf32>
    %8 = vector.multi_reduction <add>, %7, %cst_2 [1] : vector<8x32xf32> to vector<8xf32>
    %9 = vector.shape_cast %8 : vector<8xf32> to vector<8x1xf32>
    %cst_3 = arith.constant 0.0322580636 : f32
    %10 = vector.broadcast %cst_3 : f32 to vector<8x1xf32>
    %11 = arith.mulf %9, %10 : vector<8x1xf32>
    %12 = math.sqrt %11 : vector<8x1xf32>
    %cst_4 = arith.constant 9.99999997E-7 : f32
    %13 = vector.broadcast %cst_4 : f32 to vector<8x1xf32>
    %14 = arith.addf %12, %13 : vector<8x1xf32>
    %15 = tpu.reciprocal %14 : vector<8x1xf32> -> vector<8x1xf32>
    %c0_5 = arith.constant 0 : index
    %c0_6 = arith.constant 0 : index
    %16 = memref.load %arg1[%c0_5, %c0_6] : memref<1x1xf32, #tpu.memory_space<smem>>
    %c0_7 = arith.constant 0 : index
    %c0_8 = arith.constant 0 : index
    %17 = memref.load %arg2[%c0_7, %c0_8] : memref<1x1xf32, #tpu.memory_space<smem>>
    %18 = vector.broadcast %16 : f32 to vector<8x1xf32>
    %19 = arith.mulf %18, %15 : vector<8x1xf32>
    %20 = arith.mulf %4, %19 : vector<8x1xf32>
    %21 = vector.broadcast %17 : f32 to vector<8x1xf32>
    %22 = arith.subf %21, %20 : vector<8x1xf32>
    %23 = vector.broadcast %19 : vector<8x1xf32> to vector<8x32xf32>
    %24 = arith.mulf %0, %23 : vector<8x32xf32>
    %25 = vector.broadcast %22 : vector<8x1xf32> to vector<8x32xf32>
    %26 = arith.addf %24, %25 : vector<8x32xf32>
    %c0_9 = arith.constant 0 : index
    %c0_10 = arith.constant 0 : index
    %27 = vector.load %arg4[%c0_9, %c0_10] : memref<8x32xf32, #tpu.memory_space<vmem>>, vector<8x32xf32>
    tpu.vector_store %arg4[%c0_9, %c0_10], %26 {strides = array<i32>} : memref<8x32xf32, #tpu.memory_space<vmem>>, vector<8x32xf32>,
    return
  }
  func.func @transform_0(%arg0: i32) -> (i32, i32) {
    %c0_i32 = arith.constant 0 : i32
    %c0_i32_0 = arith.constant 0 : i32
    %c0_i32_1 = arith.constant 0 : i32
    return %c0_i32, %c0_i32_0 : i32, i32
  }
  func.func @transform_1(%arg0: i32) -> (i32, i32) {
    %c0_i32 = arith.constant 0 : i32
    %c0_i32_0 = arith.constant 0 : i32
    %c0_i32_1 = arith.constant 0 : i32
    return %c0_i32, %c0_i32_0 : i32, i32
  }
  func.func @transform_2(%arg0: i32) -> (i32, i32) {
    %c0_i32 = arith.constant 0 : i32
    %c0_i32_0 = arith.constant 0 : i32
    return %arg0, %c0_i32 : i32, i32
  }
  func.func @transform_3(%arg0: i32) -> (i32, i32) {
    %c0_i32 = arith.constant 0 : i32
    %c0_i32_0 = arith.constant 0 : i32
    return %arg0, %c0_i32 : i32, i32
  }
}

</mosaic_0001>

<bundles_post_ra>
// kernel: tpu_custom_call.1
= control target key start
LH: loop header
LB: loop body
LE: loop exit
PB: predicated region body
PF: predicated region fallthrough
CT: control target
= control target key end

     0   :  { %s635_s0 = inlined_call_operand.<no memory space> [shape: f32[1,1], index: 0, kind: input, shape index: {}]   ;;  %s636_s1 = inlined_call_operand.<no memory space> [shape: f32[1,1], index: 1, kind: input, shape index: {}]   ;;  %s637_s2 = inlined_call_operand.hbm [shape: f32[16,32], index: 2, kind: input, shape index: {}]   ;;  %s638_s3 = inlined_call_operand.hbm [shape: f32[16,32], index: 3, kind: output, shape index: {}]  }
   0x1   :  { %8 = sst [smem:[#allocation2]] %s635_s0 }
   0x2   :  { %9 = sst [smem:[#allocation3]] %s636_s1 }
   0x3   :  { %10 = vsyncpa [#allocation5], 0 }
   0x4   :  { %12 = vsyncpa [#allocation5 + $0x1], 0 }
   0x5   :  { %13 = vsyncpa [#allocation6], 0 }
   0x6   :  { %15 = vsyncpa [#allocation6 + $0x1], 0  ;;  %s487_s16 = smov 0   ;;  %s489_s17 = smov 0  }
   0x7   :  { %s491_s18 = smov 0   ;;  %s493_s19 = smov 0  }
   0x8 LB: > { %s508_s0 = sadd.s32 4294967295, %s457_s19   ;;  %s303_s1 = sadd.s32 4294967294, %s457_s19   ;;  %s457_s19 = sphi %s493_s19, %s655_s19   ;;  %s453_s18 = sphi %s491_s18, %s654_s18   ;;  %s449_s17 = sphi %s489_s17, %s653_s17   ;;  %s445_s16 = sphi %s487_s16, %s652_s16  }
   0x9   : > { %s512_s20 = sadd.s32 1, %s457_s19   ;;  %s70_s21 = sadd.s32 1, %s453_s18 }
   0xa   : > { %s67_s22 = ssub.s32 %s457_s19, %s512_s20  ;;  %p77_p0 = scmp.ne.s32.totalorder %s453_s18, %s449_s17 }
   0xb   : > { %p68_p1 = scmp.eq.s32.totalorder %s67_s22, 0  ;;  %p78_p2 = scmp.eq.s32.totalorder %s457_s19, 0 }
   0xc   : > { %p83_p3 = scmp.ne.s32.totalorder %s449_s17, %s445_s16  ;;  %p84_p4 = scmp.eq.s32.totalorder %s508_s0, 0 }
   0xd   : > { %s524_s23 = scalar_select %p68_p1, %s453_s18, %s70_s21  }
   0xe   : > { %p526_p5 = por %p78_p2, %p77_p0  ;;  %p530_p6 = por %p84_p4, %p83_p3 }
   0xf   : > { %p107_p7 = scmp.eq.s32.totalorder %s508_s0, 1  ;;  %p113_p8 = scmp.eq.s32.totalorder %s303_s1, 1 }
  0x10   : > { %s642_s25 = scalar_select %p530_p6, 1, 0 }
  0x11   : > { %p327_p10 = scmp.lt.s32.totalorder %s457_s19, 2  ;;  %p537_p11 = por %p107_p7, %p77_p0 }
  0x12   : > { %p541_p12 = por %p113_p8, %p83_p3  ;;  %s139_s28 = sand.u32 1, %s453_s18  }
  0x13   : > { %s643_s26 = scalar_select %p537_p11, 1, 0 }
  0x14   : > { %s644_s27 = scalar_select %p541_p12, 1, 0 }
  0x15   : > { %s307_s29 = sshll.u32 %s457_s19, 7  ;;  %s306_s30 = sshll.u32 %s139_s28, 3 }
  0x16   : > { %s550_s6 = scalar_lea.hbm %s637_s2, %s307_s29  ;;  %s143_s7 = scalar_lea.vmem [#allocation4], %s306_s30 }
  0x17   : > { %s150_s8 = sshll.u32 %s143_s7, 4  ;;  %p554_p13 = pnand %p327_p10, %p526_p5  ;;  %s558_s8 = int_to_ptr.vmem [resolvable:$true] %s150_s8 }
  0x18   : > { %s140_s10 = scalar_lea.sflag [#allocation5], %s139_s28  ;;  %s365_s11 = scalar_lea.hbm %s550_s6, 128 }
  0x19   : > { %p366_p2 = scmp.ne.s32.totalorder %s550_s6, %s365_s11  ;;  %p367_p3 = pneg %p554_p13 }
  0x1a   : > { %s370_s14 = scalar_lea.hbm %s637_s2, 256  ;;  %p371_p5 = scmp.lt.s32.totalorder %s550_s6, %s637_s2 }
  0x1b   : > { %p368_p4 = pnand %p367_p3, %p366_p2  ;;  %p372_p8 = scmp.lt.s32.totalorder %s370_s14, %s365_s11 }
  0x1d   : > { %p369_p7 = pneg %p368_p4  ;;  %p373_p10 = por %p372_p8, %p371_p5 }
  0x1f   : > { %p374_p9 = pnand %p373_p10, %p369_p7 }
  0x21   : > { %377 = shalt.err (!%p374_p9)
}
  0x22   : > { %s378_s21 = scalar_lea.vmem %s558_s8, 128  ;;  %s459_s22 = smov [#allocation4]  }
  0x23   : > { %p379_p0 = scmp.ne.s32.totalorder %s558_s8, %s378_s21  ;;  %s383_s24 = sshll.u32 %s459_s22, 4  ;;  %s384_s24 = int_to_ptr.vmem [resolvable:$false] %s383_s24 }
  0x24   : > { %s385_s28 = scalar_lea.vmem %s384_s24, 256  ;;  %p386_p4 = scmp.lt.s32.totalorder %s558_s8, %s384_s24 }
  0x25   : > { %p381_p1 = pnand %p379_p0, %p367_p3  ;;  %p387_p12 = scmp.lt.s32.totalorder %s385_s28, %s378_s21 }
  0x27   : > { %p382_p2 = pneg %p381_p1  ;;  %p388_p11 = por %p387_p12, %p386_p4 }
  0x29   : > { %p389_p6 = pnand %p388_p11, %p382_p2 }
  0x2b   : > { %392 = shalt.err (!%p389_p6)
}
  0x2c   : > { %322 = dma.hbm_to_vmem [thread:$0]  (!%p554_p13), %s550_s6, 128, %s558_s8, %s140_s10  }
  0x2d   : > { %p646_p9 = scmp.lt.s32.totalorder %s457_s19, 3  ;;  %p647_p7 = scmp.ge.s32.totalorder %s457_s19, 1 }
  0x2f   : > { %p156_p0 = pnand %p647_p7, %p646_p9 }
  0x30   : > { %s585_s29 = sand.u32 (!%p156_p0), 1, %s449_s17   ;;  %p648_p6 = scmp.ne.s32.totalorder (!%p156_p0), %s642_s25, 0 }
  0x31   : > { %159 = sbr.rel (%p156_p0) target bundleno = 397 (0x18d), region = 32  ;;  %s309_s30 = sshll.u32 (!%p156_p0), %s585_s29, 3 }
  0x32   : > { %s162_s4 = scalar_lea.sflag (!%p156_p0), [#allocation5], %s585_s29  ;;  %s165_s5 = scalar_lea.vmem (!%p156_p0), [#allocation4], %s309_s30 }
  0x36   : > { %436 = dma.done.wait (%p648_p6), %s162_s4, 128  }
  0x37   : > { %438 = vsyncadd (%p648_p6), %s162_s4, 4294967168  ;;  %vm189_vm0 = vcmask 261120   ;;  %v188_v0 = vld [vmem:[%s165_s5] sm:$0xff]  ;;  %s209_s25 = sld [smem:[#allocation2]]  ;;  %s312_s7 = sshll.u32 %s508_s0, 7 }
  0x38   : > { %v190_v1 = vsel %vm189_vm0, %v188_v0, 0.0  ;;  %s210_s6 = sld [smem:[#allocation3]]  ;;  %s187_s8 = scalar_lea.vmem [#allocation7], %s309_s30 }
  0x39   : > { %191 = vadd.xlane.f32.xlu0 %v190_v1  ;;  %s233_s9 = sshll.u32 %s187_s8, 4  ;;  %s231_s12 = scalar_lea.hbm %s638_s3, %s312_s7  ;;  %s234_s9 = int_to_ptr.vmem [resolvable:$true] %s233_s9 }
  0x3a   : > { %s220_s13 = scalar_lea.sflag [#allocation6], %s585_s29  ;;  %s393_s14 = scalar_lea.vmem %s234_s9, 128 }
  0x3b   : > { %p394_p11 = scmp.ne.s32.totalorder %s234_s9, %s393_s14  ;;  %p649_p12 = scmp.ne.s32.totalorder %s643_s26, 0 }
  0x3c   : > { %s460_s0 = smov [#allocation7]  }
  0x3d   : > { %v211_v15 = vstv %s209_s25  ;;  %p395_p13 = pnand %p394_p11, %p649_p12  ;;  %s397_s15 = sshll.u32 %s460_s0, 4  ;;  %s398_s15 = int_to_ptr.vmem [resolvable:$false] %s397_s15 }
  0x3e   : > { %v214_v18 = vstv %s210_s6  ;;  %s399_s1 = scalar_lea.vmem %s398_s15, 256  ;;  %p400_p3 = scmp.lt.s32.totalorder %s234_s9, %s398_s15 }
  0x3f   : > { %p396_p1 = pneg %p395_p13  ;;  %p401_p5 = scmp.lt.s32.totalorder %s399_s1, %s393_s14 }
  0x41   : > { %p402_p8 = por %p401_p5, %p400_p3 }
  0x43   : > { %p403_p10 = pnand %p402_p8, %p396_p1 }
  0xc2   : > { %v192_v2 = vpop.xlane.xlu0 %191 }
  0xc3   : > { %v193_v3 = vmul.f32 0.03125, %v192_v2 }
  0xc5   : > { %v194_v4 = vsub.f32 %v188_v0, %v193_v3 }
  0xc7   : > { %v195_v5 = vmul.f32 %v194_v4, %v194_v4 }
  0xc9   : > { %v196_v6 = vsel %vm189_vm0, %v195_v5, 0.0 }
  0xca   : > { %197 = vadd.xlane.f32.xlu0 %v196_v6 }
 0x153   : > { %v198_v7 = vpop.xlane.xlu0 %197 }
 0x154   : > { %v199_v8 = vmul.f32 0.032258064, %v198_v7 }
 0x156   : > { %361 = vrsqrt.f32 %v199_v8  ;;  %vm202_vm1 = vcmp.eq.f32.partialorder %v199_v8, inf  ;;  %v205_v11 = vand.u32 2147483648, %v199_v8  ;;  %vm204_vm2 = vcmp.eq.f32.partialorder %v199_v8, 0.0 }
 0x163   : > { %v362_v9 = vpop.eup %361 }
 0x164   : > { %v201_v10 = vmul.f32 %v362_v9, %v199_v8 }
 0x166   : > { %v203_v12 = vsel %vm202_vm1, %v199_v8, %v201_v10 }
 0x167   : > { %v206_v13 = vsel %vm204_vm2, %v205_v11, %v203_v12 }
 0x168   : > { %v207_v14 = vadd.f32 1e-06, %v206_v13 }
 0x16a   : > { %363 = vrcp.f32 %v207_v14 }
 0x177   : > { %v364_v16 = vpop.eup %363 }
 0x178   : > { %v212_v17 = vmul.f32 %v364_v16, %v211_v15 }
 0x17a   : > { %v213_v19 = vmul.f32 %v212_v17, %v193_v3  ;;  %v216_v21 = vmul.f32 %v212_v17, %v188_v0 }
 0x17c   : > { %v215_v20 = vsub.f32 %v214_v18, %v213_v19 }
 0x17e   : > { %v217_v22 = vadd.f32 %v216_v21, %v215_v20 }
 0x180   : > { %218 = vst.msk [vmem:[%s187_s8] sm:$0xff] %vm189_vm0, %v217_v22 }
 0x181   : > { %406 = shalt.err (!%p403_p10)
}
 0x182   : > { %s407_s21 = scalar_lea.hbm %s231_s12, 128  ;;  %s411_s28 = scalar_lea.hbm %s638_s3, 256 }
 0x183   : > { %p408_p2 = scmp.ne.s32.totalorder %s231_s12, %s407_s21  ;;  %p412_p7 = scmp.lt.s32.totalorder %s231_s12, %s638_s3 }
 0x184   : > { %p413_p0 = scmp.lt.s32.totalorder %s411_s28, %s407_s21 }
 0x185   : > { %p409_p4 = pnand %p408_p2, %p649_p12 }
 0x186   : > { %p414_p6 = por %p413_p0, %p412_p7 }
 0x187   : > { %p410_p9 = pneg %p409_p4 }
 0x189   : > { %p415_p11 = pnand %p414_p6, %p410_p9 }
 0x18b   : > { %418 = shalt.err (!%p415_p11)
}
 0x18c   : > { %317 = dma.vmem_to_hbm [thread:$0]  (%p649_p12), %s234_s9, 128, %s231_s12, %s220_s13  }
 0x18d PF: > { %s245_s4 = sand.u32 1, %s445_s16   ;;  %p650_p13 = scmp.ne.s32.totalorder %s644_s27, 0 }
 0x18e   : > { %p651_p1 = scmp.ge.s32.totalorder %s457_s19, 2  ;;  %s246_s5 = scalar_lea.sflag [#allocation6], %s245_s4 }
 0x190   : > { %p324_p3 = pnand %p651_p1, %p650_p13 }
 0x192   : > { %p325_p5 = pneg %p324_p3 }
 0x194   : > { %440 = dma.done.wait (%p325_p5), %s246_s5, 128  }
 0x195   : > { %442 = vsyncadd (%p325_p5), %s246_s5, 4294967168  ;;  %p18_p8 = scmp.ge.s32.totalorder %s512_s20, 4   ;;  %s652_s16 = smov %s449_s17 }
 0x196   : > { %s653_s17 = smov %s453_s18  ;;  %s654_s18 = smov %s524_s23 }
 0x197   : > { %s655_s19 = smov %s512_s20  ;;  %20 = sbr.rel (!%p18_p8) target bundleno = 8 (0x8), region = 77 }
 0x19c   :  { %251 = vsyncpa [#allocation5], 1 }
 0x19d   :  { %253 = vsyncpa [#allocation5 + $0x1], 1 }
 0x19e   :  { %254 = vsyncpa [#allocation6], 1 }
 0x19f   :  { %256 = vsyncpa [#allocation6 + $0x1], 1 }

</bundles_post_ra>
